<compile_context>
chip_gen: v7x
topology: tpu7x:2x2x1
jax: 0.10.0
libtpu: 0.0.40
codegen_flags: <defaults>
</compile_context>

<pallas_src>
import jax
import jax.numpy as jnp
from jax import lax
from jax.experimental import pallas as pl
from jax.experimental.pallas import tpu as pltpu


def attn_kernel(ph_ref, w_ref, b_ref, enc_ref, out_ref):
    """One batch tile of Luong attention.

    ph_ref:  [TB, L*H]   prev_hidden, flattened per batch row (bf16/f32)
    w_ref:   [L*H, H]    Linear weight, transposed (bf16/f32)
    b_ref:   [1, H]      Linear bias (f32)
    enc_ref: [S, TB, H]  encoder outputs, native seq-major layout (bf16/f32)
    out_ref: [TB, S]     row softmax over the seq axis (f32)
    """
    # energy = Linear(prev_hidden_flat): a single MXU matmul, f32 accumulation.
    energy = jnp.dot(ph_ref[...], w_ref[...],
                     preferred_element_type=jnp.float32) + b_ref[...]   # [TB, H]

    # scores[s, b] = sum_h enc[s, b, h] * energy[b, h]
    # VPU multiply + lane (XLU) reduce; keeps the MXU free of N=1 mat-vecs.
    enc = enc_ref[...].astype(jnp.float32)                              # [S, TB, H]
    scores = jnp.sum(enc * energy[None, :, :], axis=-1)                 # [S, TB]
    scores = scores.T                                                   # [TB, S] (XLU)

    # Row softmax over the seq axis; exact normalization (no approx reciprocal).
    m = jnp.max(scores, axis=1, keepdims=True)
    e = jnp.exp(scores - m)
    denom = jnp.sum(e, axis=1, keepdims=True)
    out_ref[...] = e * (1.0 / denom)


def _vmem_budget_bytes():
    """~75% of physical VMEM; conservative 48 MiB fallback (covers v7x 64 MiB/TC)."""
    cap = 64 * 1024 * 1024
    try:
        info = pltpu.get_tpu_info()
        cap = int(getattr(info, "vmem_capacity_bytes", cap))
    except Exception:
        pass
    return int(cap * 3 // 4)


def _pick_batch_tile(b_pad, seq_len, hidden, lh, in_itemsize, budget_bytes):
    """Largest sublane-aligned batch tile whose (double-buffered) blocks fit VMEM,
    preferring >= 2 grid steps so BlockSpec pipelining / TC sharding has work."""
    candidates = [tb for tb in (512, 256, 128, 64, 32, 16, 8)
                  if tb <= b_pad and b_pad % tb == 0]
    if not candidates:
        candidates = [b_pad]

    def usage(tb):
        enc_blk = seq_len * tb * hidden * in_itemsize
        return (2 * enc_blk                        # double-buffered encoder tile
                + 2 * tb * lh * in_itemsize        # double-buffered prev_hidden tile
                + 2 * lh * hidden * in_itemsize    # weight (resident)
                + 2 * tb * seq_len * 4             # double-buffered output tile
                + seq_len * tb * hidden * 4        # in-kernel f32 upcast of enc
                + 4 * tb * seq_len * 4)            # score / softmax temporaries

    fitting = [tb for tb in candidates if usage(tb) <= budget_bytes]
    if not fitting:
        # TODO(synk): tile the seq axis (online/two-pass softmax) here.
        return candidates[-1]
    multi = [tb for tb in fitting if b_pad // tb >= 2]
    return multi[0] if multi else fitting[0]


def attn_forward(prev_hidden, encoder_output, weight, bias,
                 *, compute_dtype=jnp.bfloat16):
    """prev_hidden: [L, B, H], encoder_output: [S, B, H],
    weight: [H, L*H] (PyTorch Linear layout), bias: [H].
    Returns [B, 1, S] -- identical semantics to Attn.forward."""
    L, B, H = prev_hidden.shape
    S = encoder_output.shape[0]
    LH = L * H
    itemsize = jnp.dtype(compute_dtype).itemsize

    # --- layout plumbing on SMALL tensors only; the big encoder stays put ---
    ph_flat = jnp.transpose(prev_hidden, (1, 0, 2)).reshape(B, LH).astype(compute_dtype)
    w_t = jnp.transpose(weight).astype(compute_dtype)          # [LH, H]
    b2d = bias.reshape(1, H).astype(jnp.float32)
    enc = encoder_output.astype(compute_dtype)                  # [S, B, H], native layout

    # Pad batch to a multiple of 8 (sublane alignment; keeps aligned tiles and a
    # multi-step grid for awkward B).  Padded rows are sliced off at the end.
    B_pad = ((B + 7) // 8) * 8
    if B_pad != B:
        ph_flat = jnp.pad(ph_flat, ((0, B_pad - B), (0, 0)))
        enc = jnp.pad(enc, ((0, 0), (0, B_pad - B), (0, 0)))

    vmem_budget = _vmem_budget_bytes()
    TB = _pick_batch_tile(B_pad, S, H, LH, itemsize, int(vmem_budget * 0.8))
    grid = (B_pad // TB,)

    flops = 2 * B_pad * LH * H + 2 * B_pad * S * H + 5 * B_pad * S
    bytes_accessed = (itemsize * (B_pad * LH + LH * H + S * B_pad * H)
                      + 4 * (H + B_pad * S))

    out = pl.pallas_call(
        attn_kernel,
        out_shape=jax.ShapeDtypeStruct((B_pad, S), jnp.float32),
        grid_spec=pl.GridSpec(
            grid=grid,
            in_specs=[
                pl.BlockSpec((TB, LH), lambda b: (b, 0)),        # prev_hidden (flat)
                pl.BlockSpec((LH, H), lambda b: (0, 0)),         # weight.T
                pl.BlockSpec((1, H), lambda b: (0, 0)),          # bias
                pl.BlockSpec((S, TB, H), lambda b: (0, b, 0)),   # encoder (native layout)
            ],
            out_specs=pl.BlockSpec((TB, S), lambda b: (b, 0)),
        ),
        compiler_params=pltpu.CompilerParams(
            dimension_semantics=("parallel",),   # batch tiles shard across TCs on v7x
            vmem_limit_bytes=int(vmem_budget),
        ),
        cost_estimate=pl.CostEstimate(
            flops=int(flops),
            transcendentals=int(B_pad * S + B_pad),
            bytes_accessed=int(bytes_accessed),
        ),
    )(ph_flat, w_t, b2d, enc)

    return out[:B][:, None, :]   # [B, 1, S]


def attn_reference(prev_hidden, encoder_output, weight, bias):
    """Pure-JAX mirror of the PyTorch module (f32 math, exact matmul)."""
    L, B, H = prev_hidden.shape
    ph = jnp.transpose(prev_hidden, (1, 0, 2)).reshape(B, L * H).astype(jnp.float32)
    w = weight.astype(jnp.float32)
    energy = jnp.dot(ph, w.T, precision=lax.Precision.HIGHEST) + bias.astype(jnp.float32)
    scores = jnp.sum(encoder_output.astype(jnp.float32) * energy[None, :, :], axis=2)  # [S, B]
    return jax.nn.softmax(scores.T, axis=1)[:, None, :]                                # [B, 1, S]


if __name__ == "__main__":
    n_layers = 2
    hidden_size = 32
    batch = 16          # padded/tiled into two grid steps of TB=8
    seq_len = 8

    key = jax.random.PRNGKey(0)
    k1, k2, k3, k4 = jax.random.split(key, 4)

    prev_hidden = jax.random.normal(k1, (n_layers, batch, hidden_size), jnp.float32)
    encoder_output = jax.random.normal(k2, (seq_len, batch, hidden_size), jnp.float32)

    fan_in = hidden_size * n_layers
    bound = 1.0 / (fan_in ** 0.5)
    weight = jax.random.uniform(k3, (hidden_size, fan_in), jnp.float32, -bound, bound)
    bias = jax.random.uniform(k4, (hidden_size,), jnp.float32, -bound, bound)

    # Default (bf16-input) path: compare against a reference fed the same
    # bf16-rounded inputs the kernel sees (f32 accumulation in both).
    out = jax.block_until_ready(attn_forward(prev_hidden, encoder_output, weight, bias))
    assert out.shape == (batch, 1, seq_len), out.shape
    ref_bf16 = attn_reference(prev_hidden.astype(jnp.bfloat16),
                              encoder_output.astype(jnp.bfloat16),
                              weight.astype(jnp.bfloat16), bias)
    assert jnp.allclose(out, ref_bf16, atol=1e-4, rtol=1e-4), "bf16 path mismatch vs reference"
    assert jnp.allclose(jnp.sum(out, axis=-1), 1.0, atol=1e-4), "softmax not normalized"

    # f32-input path: exact module semantics, tight tolerance.
    out_f32 = jax.block_until_ready(
        attn_forward(prev_hidden, encoder_output, weight, bias,
                     compute_dtype=jnp.float32))
    ref_f32 = attn_reference(prev_hidden, encoder_output, weight, bias)
    assert jnp.allclose(out_f32, ref_f32, atol=1e-4, rtol=1e-4), "f32 path mismatch vs reference"

    print("KERNEL_OK")
</pallas_src>

<mosaic_0001>
module attributes {stable_mosaic.version = 11 : i64} {
  func.func @attn_kernel(%arg0: i32, %arg1: memref<8x64xbf16, #tpu.memory_space<vmem>>, %arg2: memref<64x32xbf16, #tpu.memory_space<vmem>>, %arg3: memref<1x32xf32, #tpu.memory_space<vmem>>, %arg4: memref<8x8x32xbf16, #tpu.memory_space<vmem>>, %arg5: memref<8x8xf32, #tpu.memory_space<vmem>>) attributes {dimension_semantics = [#tpu.dimension_semantics<parallel>], iteration_bounds = array<i64: 2>, scalar_prefetch = 0 : i64, scratch_operands = 0 : i64, tpu.core_type = #tpu.core_type<tc>, window_params = [{transform_indices = @transform_0, window_bounds = array<i64: 8, 64>}, {pipeline_mode = #tpu.pipeline_mode<synchronous>, transform_indices = @transform_1, window_bounds = array<i64: 64, 32>}, {pipeline_mode = #tpu.pipeline_mode<synchronous>, transform_indices = @transform_2, window_bounds = array<i64: 1, 32>}, {transform_indices = @transform_3, window_bounds = array<i64: 8, 8, 32>}, {transform_indices = @transform_4, window_bounds = array<i64: 8, 8>}]} {
    %c0 = arith.constant 0 : index
    %c0_0 = arith.constant 0 : index
    %0 = vector.load %arg1[%c0, %c0_0] : memref<8x64xbf16, #tpu.memory_space<vmem>>, vector<8x64xbf16>
    %c0_1 = arith.constant 0 : index
    %c0_2 = arith.constant 0 : index
    %1 = vector.load %arg2[%c0_1, %c0_2] : memref<64x32xbf16, #tpu.memory_space<vmem>>, vector<64x32xbf16>
    %cst = arith.constant dense<0.000000e+00> : vector<8x32xf32>
    %2 = tpu.matmul %0, %1, %cst {dimension_numbers = #tpu.dot_dimension_numbers<[1], [0], [0], [1], [0, 0, 1, 1], [], []>} : vector<8x64xbf16>, vector<64x32xbf16>, vector<8x32xf32> -> vector<8x32xf32>
    %c0_3 = arith.constant 0 : index
    %c0_4 = arith.constant 0 : index
    %3 = vector.load %arg3[%c0_3, %c0_4] : memref<1x32xf32, #tpu.memory_space<vmem>>, vector<1x32xf32>
    %4 = vector.broadcast %3 : vector<1x32xf32> to vector<8x32xf32>
    %5 = arith.addf %2, %4 : vector<8x32xf32>
    %c0_5 = arith.constant 0 : index
    %c0_6 = arith.constant 0 : index
    %c0_7 = arith.constant 0 : index
    %6 = vector.load %arg4[%c0_5, %c0_6, %c0_7] : memref<8x8x32xbf16, #tpu.memory_space<vmem>>, vector<8x8x32xbf16>
    %7 = arith.extf %6 : vector<8x8x32xbf16> to vector<8x8x32xf32>
    %8 = vector.shape_cast %5 : vector<8x32xf32> to vector<1x8x32xf32>
    %9 = vector.broadcast %8 : vector<1x8x32xf32> to vector<8x8x32xf32>
    %10 = arith.mulf %7, %9 : vector<8x8x32xf32>
    %cst_8 = arith.constant dense<0.000000e+00> : vector<8x8xf32>
    %11 = vector.multi_reduction <add>, %10, %cst_8 [2] : vector<8x8x32xf32> to vector<8x8xf32>
    %12 = tpu.transpose %11, [1, 0] : vector<8x8xf32> -> vector<8x8xf32>
    %cst_9 = arith.constant dense<0xFF800000> : vector<8xf32>
    %13 = vector.multi_reduction <maximumf>, %12, %cst_9 [1] : vector<8x8xf32> to vector<8xf32>
    %14 = vector.shape_cast %13 : vector<8xf32> to vector<8x1xf32>
    %15 = vector.broadcast %14 : vector<8x1xf32> to vector<8x8xf32>
    %16 = arith.subf %12, %15 : vector<8x8xf32>
    %17 = math.exp %16 : vector<8x8xf32>
    %cst_10 = arith.constant dense<0.000000e+00> : vector<8xf32>
    %18 = vector.multi_reduction <add>, %17, %cst_10 [1] : vector<8x8xf32> to vector<8xf32>
    %19 = vector.shape_cast %18 : vector<8xf32> to vector<8x1xf32>
    %cst_11 = arith.constant 1.000000e+00 : f32
    %20 = vector.broadcast %cst_11 : f32 to vector<8x1xf32>
    %21 = arith.divf %20, %19 : vector<8x1xf32>
    %22 = vector.broadcast %21 : vector<8x1xf32> to vector<8x8xf32>
    %23 = arith.mulf %17, %22 : vector<8x8xf32>
    %c0_12 = arith.constant 0 : index
    %c0_13 = arith.constant 0 : index
    %24 = vector.load %arg5[%c0_12, %c0_13] : memref<8x8xf32, #tpu.memory_space<vmem>>, vector<8x8xf32>
    tpu.vector_store %arg5[%c0_12, %c0_13], %23 {strides = array<i32>} : memref<8x8xf32, #tpu.memory_space<vmem>>, vector<8x8xf32>,
    return
  }
  func.func @transform_0(%arg0: i32) -> (i32, i32) {
    %c0_i32 = arith.constant 0 : i32
    %c0_i32_0 = arith.constant 0 : i32
    return %arg0, %c0_i32 : i32, i32
  }
  func.func @transform_1(%arg0: i32) -> (i32, i32) {
    %c0_i32 = arith.constant 0 : i32
    %c0_i32_0 = arith.constant 0 : i32
    %c0_i32_1 = arith.constant 0 : i32
    return %c0_i32, %c0_i32_0 : i32, i32
  }
  func.func @transform_2(%arg0: i32) -> (i32, i32) {
    %c0_i32 = arith.constant 0 : i32
    %c0_i32_0 = arith.constant 0 : i32
    %c0_i32_1 = arith.constant 0 : i32
    return %c0_i32, %c0_i32_0 : i32, i32
  }
  func.func @transform_3(%arg0: i32) -> (i32, i32, i32) {
    %c0_i32 = arith.constant 0 : i32
    %c0_i32_0 = arith.constant 0 : i32
    %c0_i32_1 = arith.constant 0 : i32
    return %c0_i32, %arg0, %c0_i32_0 : i32, i32, i32
  }
  func.func @transform_4(%arg0: i32) -> (i32, i32) {
    %c0_i32 = arith.constant 0 : i32
    %c0_i32_0 = arith.constant 0 : i32
    return %arg0, %c0_i32 : i32, i32
  }
}

</mosaic_0001>

<bundles_post_ra>
// kernel: tpu_custom_call.1
= control target key start
LH: loop header
LB: loop body
LE: loop exit
PB: predicated region body
PF: predicated region fallthrough
CT: control target
= control target key end

     0   :  { %9 = vsyncpa [#allocation3], 0  ;;  %s893_s0 = inlined_call_operand.vmem [shape: bf16[16,64], index: 0, kind: input, shape index: {}]   ;;  %s894_s1 = inlined_call_operand.vmem [shape: bf16[64,32], index: 1, kind: input, shape index: {}]   ;;  %s895_s2 = inlined_call_operand.vmem [shape: f32[1,32], index: 2, kind: input, shape index: {}]   ;;  %s896_s3 = inlined_call_operand.hbm [shape: bf16[8,16,32], index: 3, kind: input, shape index: {}]   ;;  %s897_s4 = inlined_call_operand.vmem [shape: f32[16,8], index: 4, kind: output, shape index: {}]  }
   0x1   :  { %11 = vsyncpa [#allocation3 + $0x1], 0  ;;  %s748_s15 = smov 0   ;;  %s750_s16 = smov 0  }
   0x2   :  { %s752_s17 = smov 0   ;;  %s754_s18 = smov 0  }
   0x3 LB: > { %s767_s19 = sadd.s32 4294967295, %s715_s18   ;;  %s770_s20 = sadd.s32 1, %s715_s18   ;;  %s715_s18 = sphi %s754_s18, %s903_s18   ;;  %s711_s17 = sphi %s752_s17, %s902_s17   ;;  %s707_s16 = sphi %s750_s16, %s901_s16   ;;  %s703_s15 = sphi %s748_s15, %s900_s15  }
   0x4   : > { %s89_s21 = ssub.s32 %s715_s18, %s770_s20  ;;  %s92_s22 = sadd.s32 1, %s711_s17 }
   0x5   : > { %p90_p0 = scmp.eq.s32.totalorder %s89_s21, 0  ;;  %p99_p1 = scmp.ne.s32.totalorder %s711_s17, %s707_s16 }
   0x6   : > { %p100_p2 = scmp.eq.s32.totalorder %s715_s18, 0  ;;  %p105_p3 = scmp.ne.s32.totalorder %s707_s16, %s703_s15 }
   0x7   : > { %s780_s23 = scalar_select %p90_p0, %s711_s17, %s92_s22  }
   0x8   : > { %p101_p4 = por %p100_p2, %p99_p1  ;;  %p106_p5 = scmp.eq.s32.totalorder %s767_s19, 0 }
   0x9   : > { %p605_p6 = scmp.lt.s32.totalorder %s715_s18, 2  ;;  %s168_s25 = sand.u32 1, %s711_s17  }
   0xa   : > { %p784_p7 = por %p106_p5, %p105_p3  ;;  %s549_s26 = sshll.u32 %s168_s25, 5 }
   0xb   : > { %s550_s27 = sshll.u32 %s715_s18, 6  ;;  %s172_s5 = scalar_lea.vmem [#allocation2], %s549_s26 }
   0xc   : > { %s793_s30 = scalar_lea.hbm %s896_s3, %s550_s27  ;;  %s178_s6 = sshll.u32 %s172_s5, 4  ;;  %s795_s6 = int_to_ptr.vmem [resolvable:$true] %s178_s6 }
   0xd   : > { %p797_p8 = pnand %p605_p6, %p101_p4  ;;  %s801_s8 = scalar_lea.sflag [#allocation3], %s168_s25 }
   0xe   : > { %s651_s9 = scalar_lea.hbm %s793_s30, 512  ;;  %s656_s12 = scalar_lea.hbm %s896_s3, 1024 }
   0xf   : > { %p652_p9 = scmp.ne.s32.totalorder %s793_s30, %s651_s9  ;;  %p653_p10 = pneg %p797_p8 }
  0x10   : > { %p657_p13 = scmp.lt.u32.totalorder %s793_s30, %s896_s3  ;;  %p658_p0 = scmp.lt.u32.totalorder %s656_s12, %s651_s9 }
  0x11   : > { %p654_p11 = pnand %p653_p10, %p652_p9  ;;  %p660_p2 = scmp.lt.u32.totalorder %s651_s9, %s793_s30 }
  0x12   : > { %p659_p1 = por %p658_p0, %p657_p13 }
  0x13   : > { %p655_p12 = pneg %p654_p11 }
  0x14   : > { %p661_p3 = por %p660_p2, %p659_p1 }
  0x16   : > { %p662_p4 = pnand %p661_p3, %p655_p12 }
  0x18   : > { %665 = shalt.err (!%p662_p4)
}
  0x19   : > { %s666_s15 = scalar_lea.vmem %s795_s6, 512  ;;  %s717_s21 = smov [#allocation2]  }
  0x1a   : > { %p667_p5 = scmp.ne.s32.totalorder %s795_s6, %s666_s15  ;;  %s671_s22 = sshll.u32 %s717_s21, 4  ;;  %s672_s22 = int_to_ptr.vmem [resolvable:$false] %s671_s22 }
  0x1b   : > { %s673_s25 = scalar_lea.vmem %s672_s22, 1024  ;;  %p674_p11 = scmp.lt.s32.totalorder %s795_s6, %s672_s22 }
  0x1c   : > { %p669_p6 = pnand %p667_p5, %p653_p10  ;;  %p675_p13 = scmp.lt.s32.totalorder %s673_s25, %s666_s15 }
  0x1e   : > { %p670_p9 = pneg %p669_p6  ;;  %p676_p0 = por %p675_p13, %p674_p11 }
  0x20   : > { %p677_p1 = pnand %p676_p0, %p670_p9 }
  0x22   : > { %680 = shalt.err (!%p677_p1)
}
  0x23   : > { %s718_s26 = smov 128   ;;  %s719_s27 = smov 64  }
  0x24   : > { %s720_s28 = smov 4   ;;  %p551_p10 = scmp.ge.s32.totalorder %s715_s18, 1 }
  0x25   : > { %604 = dma.hbm_to_vmem [thread:$0]  (!%p797_p8), %s793_s30, 512, %s795_s6, %s801_s8, %s718_s26, %s719_s27, %s720_s28  }
  0x26   : > { %p186_p12 = scmp.lt.s32.totalorder %s715_s18, 3 }
  0x28   : > { %p187_p2 = pnand %p551_p10, %p186_p12 }
  0x29   : > { %s192_s29 = sand.u32 (!%p187_p2), 1, %s707_s16  }
  0x2a   : > { %190 = sbr.rel (%p187_p2) target bundleno = 886 (0x376), region = 36  ;;  %s552_s5 = sshll.u32 (!%p187_p2), %s192_s29, 5 }
  0x2b   : > { %s193_s9 = scalar_lea.sflag (!%p187_p2), [#allocation3], %s192_s29  ;;  %s832_s10 = scalar_lea.vmem (!%p187_p2), [#allocation2], %s552_s5 }
  0x31   : > { %698 = dma.done.wait (%p784_p7), %s193_s9, 512  }
  0x32   : > { %700 = vsyncadd (%p784_p7), %s193_s9, 4294966784  ;;  %v721_v0 = vmov 0.0   ;;  %vm722_vm0 = vmmov 0   ;;  %v643_v1 = vld [vmem:[%s894_s1] sm:$0xff]   ;;  %p224_p8 = scmp.lt.s32.totalorder %s767_s19, 1  ;;  %v644_v2 = vld [vmem:[%s894_s1 + $0x8] sm:$0xff]   ;;  %v374_v40 = vlaneseq }
  0x33   : > { %587 = vmatprep.subr.bf16.mxu0 %v721_v0  ;;  %595 = vmatprep.mubr.msk.bf16.mxu0 %vm722_vm0, %v721_v0  ;;  %v645_v3 = vld [vmem:[%s894_s1 + $0x10] sm:$0xff]   ;;  %v646_v4 = vld [vmem:[%s894_s1 + $0x18] sm:$0xff]   ;;  %vm273_vm1 = vcmask 523264   ;;  %v579_v6 = vld [vmem:[%s832_s10 + $0x8] sm:$0xff]   ;;  %vm341_vm2 = vcmask 261120   ;;  %vm408_vm3 = vcmask 1041409  }
  0x34   : > { %588 = vmatpush3.bf16.msra.mxu0 %v643_v1  ;;  %s905_s19 = smov (!%p224_p8, %s767_s19), 1  ;;  %v564_v7 = vld [vmem:[%s832_s10] sm:$0xff]   ;;  %v569_v9 = vunpack.c.l.bf16 %v579_v6  ;;  %v570_v14 = vunpack.c.h.bf16 %v579_v6  ;;  %v580_v16 = vld [vmem:[%s832_s10 + $0x10] sm:$0xff]   ;;  %v581_v27 = vld [vmem:[%s832_s10 + $0x18] sm:$0xff]   ;;  %v375_v41 = vand.u32 127, %v374_v40  ;;  %v377_v42 = vshrl.u32 %v374_v40, 7 }
  0x35   : > { %589 = vmatprep.subr.bf16.mxu0 %v721_v0  ;;  %s553_s11 = sshll.u32 %s905_s19, 2  ;;  %v555_v8 = vld [vmem:[%s895_s2] ss:$0 sm:$0xff]  ;;  %v565_v10 = vunpack.c.l.bf16 %v564_v7  ;;  %v566_v15 = vunpack.c.h.bf16 %v564_v7  ;;  %v574_v21 = vunpack.c.h.bf16 %v580_v16  ;;  %v573_v22 = vunpack.c.l.bf16 %v580_v16  ;;  %s554_s26 = sshll.u32 %s905_s19, 3 }
  0x36   : > { %s227_s21 = scalar_lea.vmem %s893_s0, %s553_s11  ;;  %v578_v28 = vunpack.c.h.bf16 %v581_v27  ;;  %v577_v29 = vunpack.c.l.bf16 %v581_v27  ;;  %v378_v45 = vsub.s32 %v375_v41, %v377_v42  ;;  %vm410_vm4 = vcmask 1042434   ;;  %s231_s29 = scalar_lea.vmem %s897_s4, %s554_s26 }
  0x37   : > { %v233_v5 = vld [vmem:[%s227_s21] sm:$0xf]  ;;  %vm412_vm5 = vcmask 1043459   ;;  %vm414_vm6 = vcmask 1044484   ;;  %vm416_vm7 = vcmask 1045509   ;;  %vm418_vm8 = vcmask 1046534  }
  0x38   : > { %590 = vmatpush3.bf16.msra.mxu0 %v644_v2  ;;  %vm420_vm9 = vcmask 1047559   ;;  %vm455_vm10 = vcmask 64512  }
  0x39   : > { %591 = vmatprep.subr.bf16.mxu0 %v721_v0 }
  0x3c   : > { %592 = vmatpush3.bf16.msra.mxu0 %v645_v3 }
  0x3d   : > { %593 = vmatprep.subr.bf16.mxu0 %v721_v0 }
  0x40   : > { %594 = vmatpush3.bf16.msra.mxu0 %v646_v4 }
  0x43   : > { %596 = vmatmul.mubr.msk.bf16.vlgmr.msra.gmra.mrb[0].mxu0 %vm273_vm1, %v233_v5 }
 0x116   : > { %v311_v11 = vpop.f32.mrb[0].mxu0 }
 0x117   : > { %v312_v12 = vadd.f32 %v555_v8, %v311_v11  ;;  %v597_v13 = vpop.f32.mrb[1].mxu0 }
 0x118   : > { %v314_v17 = vpop.f32.mrb[2].mxu0 }
 0x119   : > { %v598_v18 = vpop.f32.mrb[3].mxu0  ;;  %v335_v19 = vmul.f32 %v569_v9, %v312_v12  ;;  %v333_v20 = vmul.f32 %v565_v10, %v312_v12  ;;  %v336_v25 = vmul.f32 %v570_v14, %v312_v12  ;;  %v334_v26 = vmul.f32 %v566_v15, %v312_v12 }
 0x11a   : > { %v338_v32 = vmul.f32 %v574_v21, %v312_v12  ;;  %v337_v33 = vmul.f32 %v573_v22, %v312_v12  ;;  %v340_v36 = vmul.f32 %v578_v28, %v312_v12  ;;  %v339_v37 = vmul.f32 %v577_v29, %v312_v12 }
 0x11b   : > { %v348_v23 = vsel %vm341_vm2, %v335_v19, 0.0  ;;  %v342_v24 = vsel %vm341_vm2, %v333_v20, 0.0  ;;  %v351_v30 = vsel %vm341_vm2, %v336_v25, 0.0  ;;  %v345_v31 = vsel %vm341_vm2, %v334_v26, 0.0 }
 0x11c   : > { %349 = vadd.xlane.f32.xlu1 %v348_v23  ;;  %343 = vadd.xlane.f32.xlu0 %v342_v24  ;;  %v357_v34 = vsel %vm341_vm2, %v338_v32, 0.0  ;;  %v354_v35 = vsel %vm341_vm2, %v337_v33, 0.0  ;;  %v363_v38 = vsel %vm341_vm2, %v340_v36, 0.0  ;;  %v360_v39 = vsel %vm341_vm2, %v339_v37, 0.0 }
 0x120   : > { %352 = vadd.xlane.f32.xlu1 %v351_v30  ;;  %346 = vadd.xlane.f32.xlu0 %v345_v31 }
 0x124   : > { %358 = vadd.xlane.f32.xlu1 %v357_v34  ;;  %355 = vadd.xlane.f32.xlu0 %v354_v35 }
 0x128   : > { %364 = vadd.xlane.f32.xlu1 %v363_v38  ;;  %361 = vadd.xlane.f32.xlu0 %v360_v39 }
 0x1a9   : > { %v350_v43 = vpop.xlane.xlu1 %349  ;;  %v344_v44 = vpop.xlane.xlu0 %343 }
 0x1aa   : > { %v379_v48 = vrot.slane %v344_v44, %v378_v45  ;;  %v387_v50 = vrot.slane %v350_v43, %v378_v45 }
 0x1ad   : > { %v353_v46 = vpop.xlane.xlu1 %352  ;;  %v347_v47 = vpop.xlane.xlu0 %346 }
 0x1ae   : > { %v383_v49 = vrot.slane %v347_v47, %v378_v45  ;;  %v391_v51 = vrot.slane %v353_v46, %v378_v45 }
 0x1b0   : > { %v409_v52 = vsel %vm408_vm3, %v383_v49, %v379_v48 }
 0x1b1   : > { %v411_v53 = vsel %vm410_vm4, %v387_v50, %v409_v52  ;;  %v359_v54 = vpop.xlane.xlu1 %358  ;;  %v356_v55 = vpop.xlane.xlu0 %355 }
 0x1b2   : > { %v413_v56 = vsel %vm412_vm5, %v391_v51, %v411_v53  ;;  %v395_v57 = vrot.slane %v356_v55, %v378_v45  ;;  %v399_v58 = vrot.slane %v359_v54, %v378_v45 }
 0x1b4   : > { %v415_v59 = vsel %vm414_vm6, %v395_v57, %v413_v56 }
 0x1b5   : > { %v365_v60 = vpop.xlane.xlu1 %364  ;;  %v362_v61 = vpop.xlane.xlu0 %361  ;;  %v417_v0 = vsel %vm416_vm7, %v399_v58, %v415_v59 }
 0x1b6   : > { %v407_v62 = vrot.slane %v365_v60, %v378_v45  ;;  %v403_v63 = vrot.slane %v362_v61, %v378_v45 }
 0x1b8   : > { %v419_v1 = vsel %vm418_vm8, %v403_v63, %v417_v0 }
 0x1b9   : > { %v421_v2 = vsel %vm420_vm9, %v407_v62, %v419_v1 }
 0x1ba   : > { %423 = vxpose.xlu0.b32.start.end [1/1] (short) (narrow) %v421_v2, 8 }
 0x23a   : > { %v439_v3 = vpop.trf.xlu0 }
 0x23b   : > { %v456_v4 = vsel %vm455_vm10, %v439_v3, -inf }
 0x23c   : > { %457 = vmax.xlane.f32.xlu1 %v456_v4 }
 0x2c9   : > { %v458_v5 = vpop.xlane.xlu1 %457 }
 0x2ca   : > { %v459_v6 = vsub.f32 %v439_v3, %v458_v5 }
 0x2cc   : > { %v460_v7 = vmul.f32 1.442695, %v459_v6 }
 0x2ce   : > { %647 = vpow2.f32 %v460_v7 }
 0x2d8   : > { %v648_v8 = vpop.eup %647 }
 0x2d9   : > { %v462_v9 = vsel %vm455_vm10, %v648_v8, 0.0 }
 0x2da   : > { %463 = vadd.xlane.f32.xlu1 %v462_v9 }
 0x367   : > { %v464_v10 = vpop.xlane.xlu1 %463 }
 0x368   : > { %649 = vrcp.f32 %v464_v10 }
 0x372   : > { %v650_v11 = vpop.eup %649 }
 0x373   : > { %v467_v12 = vmul.f32 %v650_v11, %v648_v8 }
 0x375   : > { %468 = vst.msk [vmem:[%s231_s29] sm:$0xff] %vm455_vm10, %v467_v12 }
 0x376 PF: > { %p14_p7 = scmp.ge.s32.totalorder %s770_s20, 4   ;;  %s900_s15 = smov %s707_s16 }
 0x377   : > { %s901_s16 = smov %s711_s17  ;;  %s902_s17 = smov %s780_s23 }
 0x378   : > { %s903_s18 = smov %s770_s20  ;;  %16 = sbr.rel (!%p14_p7) target bundleno = 3 (0x3), region = 79 }
 0x37f   :  { %488 = vsyncpa [#allocation3], 1 }
 0x380   :  { %490 = vsyncpa [#allocation3 + $0x1], 1 }

</bundles_post_ra>
